<compile_context>
chip_gen: v5e
topology: v5e:2x2
jax: 0.10.0
libtpu: 0.0.40
codegen_flags: <defaults>
</compile_context>

<pallas_src>
import jax
import jax.numpy as jnp
import numpy as np
from jax.experimental import pallas as pl
from jax.experimental.pallas import tpu as pltpu

TEMPERATURE = 0.07
BASE_TEMPERATURE = 0.07
_NEG_BIG = -1e30


def _supcon_pairneg_kernel(feat_ref, mask_ref, out_ref):
    f = feat_ref[...].astype(jnp.float32)      # [B, D]
    m = mask_ref[...].astype(jnp.float32)      # [B, B]
    B = f.shape[0]
    neg_big = jnp.float32(_NEG_BIG)
    inv_t = jnp.float32(1.0 / TEMPERATURE)

    # Sample j is kept iff its mask ROW has a positive.  The reference asserts
    # mask symmetry, so column sums equal transposed row sums: one sublane
    # reduce gives the column-validity vector with no transpose / diag trick.
    row_sum = jnp.sum(m, axis=1, keepdims=True)          # [B, 1]
    col_sum = jnp.sum(m, axis=0, keepdims=True)          # [1, B]
    valid_row = row_sum > 0.0                             # [B, 1] bool
    valid_col = col_sum > 0.0                             # [1, B] bool

    # Gram matrix on the MXU; contract dim 1 of both operands (no f.T).
    # HIGHEST: Mosaic only lowers DEFAULT(bf16)/HIGHEST(f32); bf16 would not
    # hold tolerance after the 1/T = 14.3x amplification.
    adc = jax.lax.dot_general(
        f, f, (((1,), (1,)), ((), ())),
        preferred_element_type=jnp.float32,
        precision=jax.lax.Precision.HIGHEST) * inv_t      # [B, B]

    # Diagonal exclusion (the reference's logits_mask).
    ii = jax.lax.broadcasted_iota(jnp.int32, (B, B), 0)
    jj = jax.lax.broadcasted_iota(jnp.int32, (B, B), 1)
    off_diag = ii != jj                                    # [B, B] bool

    # Masked, numerically-stable log-sum-exp denominator over valid,
    # off-diagonal columns.  The reference's logits_max shift cancels
    # algebraically, so adc is used directly (one fewer [B,B] pass).
    denom_keep = jnp.logical_and(off_diag, valid_col)      # [B, B] bool
    den_logits = jnp.where(denom_keep, adc, neg_big)
    m2 = jnp.max(den_logits, axis=1, keepdims=True)        # [B, 1]
    s = jnp.sum(jnp.exp(den_logits - m2), axis=1, keepdims=True)  # >= 1 for real rows
    lse = m2 + jnp.log(s)                                  # [B, 1]

    # Positives: for a symmetric mask, invalid columns are already all-zero,
    # so `m` is the effective positive mask and pos_sum == row_sum.
    pos_dot = jnp.sum(m * adc, axis=1, keepdims=True)      # [B, 1]
    safe_pos = jnp.where(valid_row, row_sum, 1.0)
    # mean log-prob over positives: sum(m*(adc - lse))/sum(m) == pos_dot/sum - lse
    mlpn = pos_dot / safe_pos - lse                        # [B, 1]
    lossn = jnp.float32(-(TEMPERATURE / BASE_TEMPERATURE)) * mlpn
    lossn = jnp.where(valid_row, lossn, 0.0)               # explicit zero for dropped rows

    n_valid = jnp.maximum(jnp.sum(valid_row.astype(jnp.float32)), jnp.float32(1.0))
    out_ref[0, 0] = jnp.sum(lossn) / n_valid


def supcon_loss_pair_neg_mask(features, mask):
    """features: [B, D] float, mask: [B, B] (float/int/bool). Returns scalar f32 loss."""
    # TODO(synk): the original module reshapes >2-D features to [B, C, -1] and
    # batch-matmuls; only the 2-D path is implemented here (trailing dims are
    # flattened).
    if features.ndim > 2:
        features = features.reshape(features.shape[0], -1)
    # No forced dtype casts here: mask may be passed as int8/bool to cut the
    # O(B^2) DMA bytes; casting happens after the load, inside the kernel.
    out = pl.pallas_call(
        _supcon_pairneg_kernel,
        out_shape=jax.ShapeDtypeStruct((1, 1), jnp.float32),
        in_specs=[
            pl.BlockSpec(memory_space=pltpu.MemorySpace.VMEM),
            pl.BlockSpec(memory_space=pltpu.MemorySpace.VMEM),
        ],
        out_specs=pl.BlockSpec(memory_space=pltpu.MemorySpace.SMEM),
    )(features, mask)
    return out[0, 0]


def _reference_numpy(features, mask):
    """Direct f64 numpy transcription of the PyTorch forward (with row filtering)."""
    feat = np.asarray(features, dtype=np.float64)
    m = np.asarray(mask, dtype=np.float64)
    idx = np.where(m.sum(1) > 0)[0]
    feat = feat[idx, :]
    m = m[np.ix_(idx, idx)]
    assert np.array_equal(m, m.T)
    adc = feat @ feat.T / TEMPERATURE
    logits = adc - adc.max(axis=1, keepdims=True)
    logits_mask = np.ones_like(m)
    np.fill_diagonal(logits_mask, 0.0)
    exp_logits = np.exp(logits) * logits_mask
    log_prob = logits - np.log(exp_logits.sum(1, keepdims=True))
    mlpn = (m * log_prob).sum(1) / m.sum(1)
    lossn = -(TEMPERATURE / BASE_TEMPERATURE) * mlpn
    return lossn.mean()


if __name__ == "__main__":
    B, D = 8, 32
    key = jax.random.PRNGKey(0)
    feats = jax.random.normal(key, (B, D), dtype=jnp.float32)
    # Contrastive losses operate on L2-normalized embeddings; this also keeps
    # the f32 kernel and the f64 reference in the same (non-underflowing) regime.
    feats = feats / jnp.linalg.norm(feats, axis=1, keepdims=True)

    # Subject/group ids; index 5 is a singleton -> its mask row is all zero and
    # the sample is excluded (mask.sum(1) > 0 filtering path is exercised).
    groups = np.array([0, 0, 1, 1, 1, 2, 3, 3], dtype=np.int32)
    mask_np = (groups[:, None] == groups[None, :]).astype(np.float32)
    np.fill_diagonal(mask_np, 0.0)
    mask = jnp.asarray(mask_np)

    loss = supcon_loss_pair_neg_mask(feats, mask)
    loss = jax.block_until_ready(loss)

    ref = _reference_numpy(np.asarray(feats), mask_np)
    assert np.isfinite(float(loss)), float(loss)
    assert np.allclose(float(loss), float(ref), rtol=2e-3, atol=2e-3), (float(loss), float(ref))
    print("KERNEL_OK")
</pallas_src>

<mosaic_0001>
module attributes {stable_mosaic.version = 11 : i64} {
  func.func @_supcon_pairneg_kernel(%arg0: memref<8x32xf32, #tpu.memory_space<vmem>>, %arg1: memref<8x8xf32, #tpu.memory_space<vmem>>, %arg2: memref<1x1xf32, #tpu.memory_space<smem>>) attributes {dimension_semantics = [], scalar_prefetch = 0 : i64, scratch_operands = 0 : i64, tpu.core_type = #tpu.core_type<tc>} {
    %c0 = arith.constant 0 : index
    %c0_0 = arith.constant 0 : index
    %0 = vector.load %arg0[%c0, %c0_0] : memref<8x32xf32, #tpu.memory_space<vmem>>, vector<8x32xf32>
    %c0_1 = arith.constant 0 : index
    %c0_2 = arith.constant 0 : index
    %1 = vector.load %arg1[%c0_1, %c0_2] : memref<8x8xf32, #tpu.memory_space<vmem>>, vector<8x8xf32>
    %cst = arith.constant dense<0.000000e+00> : vector<8xf32>
    %2 = vector.multi_reduction <add>, %1, %cst [1] : vector<8x8xf32> to vector<8xf32>
    %3 = vector.shape_cast %2 : vector<8xf32> to vector<8x1xf32>
    %cst_3 = arith.constant dense<0.000000e+00> : vector<8xf32>
    %4 = vector.multi_reduction <add>, %1, %cst_3 [0] : vector<8x8xf32> to vector<8xf32>
    %5 = vector.shape_cast %4 : vector<8xf32> to vector<1x8xf32>
    %cst_4 = arith.constant 0.000000e+00 : f32
    %6 = vector.broadcast %cst_4 : f32 to vector<8x1xf32>
    %7 = arith.cmpf ogt, %3, %6 : vector<8x1xf32>
    %cst_5 = arith.constant 0.000000e+00 : f32
    %8 = vector.broadcast %cst_5 : f32 to vector<1x8xf32>
    %9 = arith.cmpf ogt, %5, %8 : vector<1x8xf32>
    %cst_6 = arith.constant dense<0.000000e+00> : vector<8x8xf32>
    %10 = tpu.matmul %0, %0, %cst_6 {dimension_numbers = #tpu.dot_dimension_numbers<[1], [1], [0], [0], [0, 0, 1, 0], [], []>, precision = #tpu.contract_precision<fp32>} : vector<8x32xf32>, vector<8x32xf32>, vector<8x8xf32> -> vector<8x8xf32>
    %cst_7 = arith.constant 14.2857141 : f32
    %11 = vector.broadcast %cst_7 : f32 to vector<8x8xf32>
    %12 = arith.mulf %10, %11 : vector<8x8xf32>
    %13 = tpu.iota {dimensions = array<i32: 0>} : vector<8x8xi32>
    %14 = tpu.iota {dimensions = array<i32: 1>} : vector<8x8xi32>
    %15 = arith.cmpi ne, %13, %14 : vector<8x8xi32>
    %16 = vector.broadcast %9 : vector<1x8xi1> to vector<8x8xi1>
    %17 = arith.andi %15, %16 : vector<8x8xi1>
    %cst_8 = arith.constant -1.000000e+30 : f32
    %18 = vector.broadcast %cst_8 : f32 to vector<8x8xf32>
    %19 = arith.select %17, %12, %18 : vector<8x8xi1>, vector<8x8xf32>
    %cst_9 = arith.constant dense<0xFF800000> : vector<8xf32>
    %20 = vector.multi_reduction <maximumf>, %19, %cst_9 [1] : vector<8x8xf32> to vector<8xf32>
    %21 = vector.shape_cast %20 : vector<8xf32> to vector<8x1xf32>
    %22 = vector.broadcast %21 : vector<8x1xf32> to vector<8x8xf32>
    %23 = arith.subf %19, %22 : vector<8x8xf32>
    %24 = math.exp %23 : vector<8x8xf32>
    %cst_10 = arith.constant dense<0.000000e+00> : vector<8xf32>
    %25 = vector.multi_reduction <add>, %24, %cst_10 [1] : vector<8x8xf32> to vector<8xf32>
    %26 = vector.shape_cast %25 : vector<8xf32> to vector<8x1xf32>
    %27 = math.log %26 : vector<8x1xf32>
    %28 = arith.addf %21, %27 : vector<8x1xf32>
    %29 = arith.mulf %1, %12 : vector<8x8xf32>
    %cst_11 = arith.constant dense<0.000000e+00> : vector<8xf32>
    %30 = vector.multi_reduction <add>, %29, %cst_11 [1] : vector<8x8xf32> to vector<8xf32>
    %31 = vector.shape_cast %30 : vector<8xf32> to vector<8x1xf32>
    %cst_12 = arith.constant 1.000000e+00 : f32
    %32 = vector.broadcast %cst_12 : f32 to vector<8x1xf32>
    %33 = arith.select %7, %3, %32 : vector<8x1xi1>, vector<8x1xf32>
    %34 = arith.divf %31, %33 : vector<8x1xf32>
    %35 = arith.subf %34, %28 : vector<8x1xf32>
    %cst_13 = arith.constant -1.000000e+00 : f32
    %36 = vector.broadcast %cst_13 : f32 to vector<8x1xf32>
    %37 = arith.mulf %36, %35 : vector<8x1xf32>
    %cst_14 = arith.constant 0.000000e+00 : f32
    %38 = vector.broadcast %cst_14 : f32 to vector<8x1xf32>
    %39 = arith.select %7, %37, %38 : vector<8x1xi1>, vector<8x1xf32>
    %40 = arith.extui %7 : vector<8x1xi1> to vector<8x1xi32>
    %41 = arith.sitofp %40 : vector<8x1xi32> to vector<8x1xf32>
    %42 = vector.shape_cast %41 : vector<8x1xf32> to vector<1x8x1xf32>
    %cst_15 = arith.constant dense<0.000000e+00> : vector<1xf32>
    %43 = vector.multi_reduction <add>, %42, %cst_15 [1, 2] : vector<1x8x1xf32> to vector<1xf32>
    %44 = vector.shape_cast %43 : vector<1xf32> to vector<1x1x1xf32>
    %45 = vector.extract %44[0, 0, 0] : f32 from vector<1x1x1xf32>
    %cst_16 = arith.constant 1.000000e+00 : f32
    %46 = arith.maximumf %45, %cst_16 : f32
    %47 = vector.shape_cast %39 : vector<8x1xf32> to vector<1x8x1xf32>
    %cst_17 = arith.constant dense<0.000000e+00> : vector<1xf32>
    %48 = vector.multi_reduction <add>, %47, %cst_17 [1, 2] : vector<1x8x1xf32> to vector<1xf32>
    %49 = vector.shape_cast %48 : vector<1xf32> to vector<1x1x1xf32>
    %50 = vector.extract %49[0, 0, 0] : f32 from vector<1x1x1xf32>
    %51 = arith.divf %50, %46 : f32
    %c0_18 = arith.constant 0 : index
    %c0_19 = arith.constant 0 : index
    %52 = memref.load %arg2[%c0_18, %c0_19] : memref<1x1xf32, #tpu.memory_space<smem>>
    memref.store %51, %arg2[%c0_18, %c0_19] : memref<1x1xf32, #tpu.memory_space<smem>>
    return
  }
}

</mosaic_0001>

<bundles_post_ra>
// kernel: tpu_custom_call.1
= control target key start
LH: loop header
LB: loop body
LE: loop exit
PB: predicated region body
PF: predicated region fallthrough
CT: control target
= control target key end

     0   :  { %7 = vsyncpa [#allocation3], 0  ;;  %s440_s0 = inlined_call_operand.hbm [shape: f32[8,32], index: 0, kind: input, shape index: {}]   ;;  %s441_s1 = inlined_call_operand.hbm [shape: f32[8,8], index: 1, kind: input, shape index: {}]   ;;  %s442_s2 = inlined_call_operand.hbm [shape: f32[1,1], index: 2, kind: output, shape index: {}]  }
   0x1   :  { %8 = vsyncpa [#allocation6], 0 }
   0x2   :  { %9 = vsyncpa [#allocation4], 0  ;;  %s15_s11 = sshll.u32 %s440_s0, 4  ;;  %s395_s12 = smov [#allocation2]   ;;  %s16_s11 = int_to_ptr.hbm [resolvable:$true] %s15_s11 }
   0x3   :  { %s17_s13 = sshll.u32 %s395_s12, 4  ;;  %s26_s16 = sshll.u32 %s441_s1, 4  ;;  %s18_s13 = int_to_ptr.vmem [resolvable:$true] %s17_s13  ;;  %s27_s16 = int_to_ptr.hbm [resolvable:$true] %s26_s16 }
   0x4   :  { %20 = dma.hbm_to_vmem [thread:$0]  %s16_s11, 128, %s18_s13, [#allocation3]  }
   0x5   :  { %s396_s17 = smov [#allocation5]  }
   0x6   :  { %s28_s18 = sshll.u32 %s396_s17, 4  ;;  %s29_s18 = int_to_ptr.vmem [resolvable:$true] %s28_s18 }
   0x7   :  { %31 = dma.hbm_to_vmem [thread:$0]  %s27_s16, 128, %s29_s18, [#allocation6]  }
   0x8   :  { %389 = dma.done.wait [#allocation3], 128  }
   0x9   :  { %390 = vsyncadd [#allocation3], 4294967168 }
   0xa   :  { %391 = dma.done.wait [#allocation6], 128  }
   0xb   :  { %392 = vsyncadd [#allocation6], 4294967168  ;;  %vm54_vm0 = vcmask 261120   ;;  %vm42_vm1 = vcmask 64512   ;;  %v40_v0 = vld [vmem:[#allocation2] sm:$0xff]  ;;  %v41_v1 = vld [vmem:[#allocation5] sm:$0xff]  ;;  %v205_v19 = vlaneseq }
   0xc   :  { %v56_v2 = vsel %vm54_vm0, %v40_v0, 0  ;;  %v43_v3 = vsel %vm42_vm1, %v41_v1, 0.0  ;;  %vm251_vm2 = vcmask 7168   ;;  %v397_v11 = vmov 0.0   ;;  %s398_s1 = smov 1.0   ;;  %s297_s22 = sshll.u32 %s442_s2, 4  ;;  %s298_s22 = int_to_ptr.hbm [resolvable:$true] %s297_s22 }
   0xd   :  { %v73_v4 = vand.u32 4294901760, %v56_v2  ;;  %44 = vadd.xlane.f32.xlu0 %v43_v3  ;;  %v46_v9 = vrot.slane %v43_v3, 4  ;;  %v206_v26 = vshrl.u32 %v205_v19, 7  ;;  %v208_v27 = vand.u32 127, %v205_v19  ;;  %s399_s26 = smov [#allocation7]  }
   0xf   :  { %v76_v5 = vsub.f32 %v56_v2, %v73_v4  ;;  %74 = vmatpush.xpose.msra.mxu0 %v73_v4  ;;  %150 = vmatpush.xpose.msra.mxu3 %v73_v4  ;;  %v47_v13 = vadd.f32 %v46_v9, %v43_v3  ;;  %vm209_vm5 = vcmp.ne.s32.totalorder %v206_v26, %v208_v27 }
  0x11   :  { %127 = vmatpush.xpose.msra.mxu2 %v76_v5  ;;  %v77_v6 = vand.u32 4294901760, %v76_v5  ;;  %v48_v15 = vrot.slane %v47_v13, 2 }
  0x13   :  { %v78_v7 = vsub.f32 %v76_v5, %v77_v6  ;;  %154 = vmatmul.f32.vlgmr.msra.gmra.mxu3 %v77_v6  ;;  %176 = vmatpush.xpose.msrb.mxu0 %v77_v6  ;;  %v49_v16 = vadd.f32 %v48_v15, %v47_v13 }
  0x14   :  { %130 = vmatmul.f32.vlgmr.msra.gmra.mxu2 %v76_v5 }
  0x15   :  { %v79_v8 = vand.u32 4294901760, %v78_v7  ;;  %v50_v18 = vrot.slane %v49_v16, 1 }
  0x17   :  { %104 = vmatpush.xpose.msra.mxu1 %v79_v8  ;;  %80 = vmatmul.f32.vlgmr.msra.gmra.mxu0 %v79_v8  ;;  %v51_v25 = vadd.f32 %v50_v18, %v49_v16 }
  0x19   :  { %vm53_vm4 = vcmp.gt.f32.partialorder %v51_v25, 0.0 }
  0x1a   :  { %106 = vmatmul.f32.vlgmr.msra.gmra.mxu1 %v73_v4  ;;  %vm212_vm6 = vmand %vm209_vm5, %vm53_vm4 }
  0x1b   :  { %198 = vmatpush.xpose.msrb.mxu1 %v73_v4 }
  0x1f   :  { %178 = vmatmul.f32.vlgmr.msrb.gmra.mxu0 %v73_v4 }
  0x22   :  { %200 = vmatmul.f32.vlgmr.msrb.gmra.mxu1 %v73_v4 }
  0x80   :  { %v422_v10 = vpop.xlane.xlu0 %44 }
  0x81   :  { %vm52_vm3 = vcmp.gt.f32.partialorder %v422_v10, 0.0 }
  0x82   :  { %v309_v12 = vsel %vm52_vm3, 1.0, %v397_v11  ;;  %v230_v50 = vsel %vm52_vm3, %v422_v10, 1.0 }
  0x83   :  { %v252_v14 = vsel %vm251_vm2, %v309_v12, 0.0  ;;  %vm236_vm7 = vweird.f32 %v230_v50  ;;  %v242_v56 = vand.u32 2147483648, %v230_v50  ;;  %v240_v58 = vand.u32 2147483647, %v230_v50 }
  0x84   :  { %253 = vadd.xlane.f32.xlu1 %v252_v14 }
  0x85   :  { %v243_v59 = vor.u32 1.1754944e-38, %v242_v56  ;;  %vm241_vm10 = vcmp.eq.f32.partialorder %v240_v58, 8.507059e+37 }
  0x94   :  { %v81_v17 = vpop.f32.mrf.mxu0 }
  0x96   :  { %v155_v23 = vpop.f32.mrf.mxu3 }
  0x97   :  { %v107_v20 = vpop.f32.mrf.mxu1  ;;  %v131_v21 = vpop.f32.mrf.mxu2 }
  0x98   :  { %v108_v22 = vadd.f32 %v107_v20, %v81_v17 }
  0x9a   :  { %v132_v24 = vadd.f32 %v131_v21, %v108_v22 }
  0x9c   :  { %v156_v28 = vadd.f32 %v155_v23, %v132_v24  ;;  %v179_v29 = vpop.f32.mrf.mxu0 }
  0x9e   :  { %v180_v30 = vadd.f32 %v179_v29, %v156_v28 }
  0x9f   :  { %v201_v31 = vpop.f32.mrf.mxu1 }
  0xa0   :  { %v202_v32 = vadd.f32 %v201_v31, %v180_v30 }
  0xa2   :  { %v204_v33 = vmul.f32 14.285714, %v202_v32 }
  0xa4   :  { %v213_v34 = vsel %vm212_vm6, %v204_v33, -1e+30  ;;  %v226_v35 = vmul.f32 %v204_v33, %v41_v1 }
  0xa5   :  { %v214_v36 = vsel %vm42_vm1, %v213_v34, -inf }
  0xa6   :  { %215 = vmax.xlane.f32.xlu0 %v214_v36  ;;  %v227_v37 = vsel %vm42_vm1, %v226_v35, 0.0 }
  0xa7   :  { %228 = vadd.xlane.f32.xlu2 %v227_v37 }
  0xf7   :  { %v254_v38 = vpop.xlane.xlu1 %253 }
  0xf8   :  { %v255_v39 = vrot.slane %v254_v38, 4 }
  0xfa   :  { %v256_v40 = vadd.f32 %v255_v39, %v254_v38 }
  0xfc   :  { %v257_v41 = vrot.slane %v256_v40, 2 }
  0xfe   :  { %v258_v42 = vadd.f32 %v257_v41, %v256_v40 }
 0x100   :  { %v259_v43 = vrot.slane %v258_v42, 1 }
 0x102   :  { %v260_v44 = vadd.f32 %v259_v43, %v258_v42 }
 0x104   :  { %310 = vpush %v260_v44 }
 0x119   :  { %v216_v45 = vpop.xlane.xlu0 %215 }
 0x11a   :  { %v217_v46 = vsub.f32 %v213_v34, %v216_v45  ;;  %v229_v62 = vpop.xlane.xlu2 %228 }
 0x11c   :  { %v218_v47 = vmul.f32 1.442695, %v217_v46 }
 0x11e   :  { %321 = vpow2.f32 %v218_v47 }
 0x11f   :  { %323 = vrcp.f32 %v230_v50 }
 0x124   :  { %v322_v48 = vpop.eup %321 }
 0x125   :  { %v220_v49 = vsel %vm42_vm1, %v322_v48, 0.0  ;;  %v324_v51 = vpop.eup %323 }
 0x126   :  { %221 = vadd.xlane.f32.xlu1 %v220_v49  ;;  %v232_v52 = vmul.f32 %v324_v51, %v230_v50  ;;  %vm237_vm8 = vweird.f32 %v324_v51 }
 0x127   :  { %vm238_vm9 = vmor %vm236_vm7, %vm237_vm8 }
 0x128   :  { %v233_v53 = vsub.f32 1.0, %v232_v52 }
 0x12a   :  { %v234_v54 = vmul.f32 %v324_v51, %v233_v53 }
 0x12c   :  { %v235_v57 = vadd.f32 %v324_v51, %v234_v54 }
 0x12e   :  { %v239_v60 = vsel %vm238_vm9, %v324_v51, %v235_v57 }
 0x12f   :  { %v244_v0 = vsel %vm241_vm10, %v243_v59, %v239_v60 }
 0x130   :  { %v245_v1 = vmul.f32 %v244_v0, %v229_v62 }
 0x135   :  { %s311_s0 = spop %310 }
 0x136   :  { %s262_s19 = smax.f32 %s398_s1, %s311_s0 }
 0x137   :  { %v273_v7 = vstv %s262_s19 }
 0x138   :  { %vm279_vm11 = vweird.f32 %v273_v7  ;;  %v285_v10 = vand.u32 2147483648, %v273_v7  ;;  %v283_v18 = vand.u32 2147483647, %v273_v7 }
 0x13a   :  { %v286_v21 = vor.u32 1.1754944e-38, %v285_v10  ;;  %vm284_vm14 = vcmp.eq.f32.partialorder %v283_v18, 8.507059e+37 }
 0x199   :  { %v222_v55 = vpop.xlane.xlu1 %221 }
 0x19a   :  { %325 = vlog2.f32 %v222_v55 }
 0x19b   :  { %327 = vrcp.f32 %v273_v7 }
 0x1a0   :  { %v326_v61 = vpop.eup %325 }
 0x1a1   :  { %v224_v63 = vmul.f32 0.6931472, %v326_v61  ;;  %v328_v8 = vpop.eup %327 }
 0x1a2   :  { %v275_v9 = vmul.f32 %v328_v8, %v273_v7  ;;  %vm280_vm12 = vweird.f32 %v328_v8 }
 0x1a3   :  { %v225_v2 = vadd.f32 %v224_v63, %v216_v45  ;;  %vm281_vm13 = vmor %vm279_vm11, %vm280_vm12 }
 0x1a4   :  { %v276_v11 = vsub.f32 1.0, %v275_v9 }
 0x1a5   :  { %v246_v3 = vsub.f32 %v245_v1, %v225_v2 }
 0x1a6   :  { %v277_v14 = vmul.f32 %v328_v8, %v276_v11 }
 0x1a7   :  { %v247_v4 = vmul.f32 -1.0, %v246_v3 }
 0x1a8   :  { %v278_v17 = vadd.f32 %v328_v8, %v277_v14 }
 0x1a9   :  { %v248_v5 = vsel %vm52_vm3, %v247_v4, 0.0 }
 0x1aa   :  { %v263_v6 = vsel %vm251_vm2, %v248_v5, 0.0  ;;  %v282_v22 = vsel %vm281_vm13, %v328_v8, %v278_v17 }
 0x1ab   :  { %264 = vadd.xlane.f32.xlu2 %v263_v6  ;;  %v287_v24 = vsel %vm284_vm14, %v286_v21, %v282_v22 }
 0x21e   :  { %v265_v12 = vpop.xlane.xlu2 %264 }
 0x21f   :  { %v266_v13 = vrot.slane %v265_v12, 4 }
 0x221   :  { %v267_v15 = vadd.f32 %v266_v13, %v265_v12 }
 0x223   :  { %v268_v16 = vrot.slane %v267_v15, 2 }
 0x225   :  { %v269_v19 = vadd.f32 %v268_v16, %v267_v15 }
 0x227   :  { %v270_v20 = vrot.slane %v269_v19, 1 }
 0x229   :  { %v271_v23 = vadd.f32 %v270_v20, %v269_v19 }
 0x22b   :  { %312 = vpush %v271_v23 }
 0x22c   :  { %314 = vpush %v287_v24 }
 0x25c   :  { %s313_s23 = spop %312 }
 0x25d   :  { %s315_s24 = spop %314 }
 0x25e   :  { %s289_s25 = smul.f32 %s315_s24, %s313_s23 }
 0x260   :  { %291 = sst [smem:[#allocation7]] %s289_s25 }
 0x261   :  { %300 = dma.smem_to_hbm %s399_s26, 16, %s298_s22, [#allocation4]  }
 0x262   :  { %393 = dma.done.wait [#allocation4], 16  }
 0x263   :  { %394 = vsyncadd [#allocation4], 4294967280 }
 0x264   :  { %305 = sfence }
 0x265   :  { %306 = vsyncpa [#allocation3], 1 }
 0x266   :  { %307 = vsyncpa [#allocation6], 1 }
 0x267   :  { %308 = vsyncpa [#allocation4], 1 }

</bundles_post_ra>
